<compile_context>
chip_gen: v7x
topology: tpu7x:2x2x1
jax: 0.10.0
libtpu: 0.0.40
codegen_flags: <defaults>
</compile_context>

<pallas_src>
import functools

import jax
import jax.numpy as jnp
from jax.experimental import pallas as pl
from jax.experimental.pallas import tpu as pltpu


def _pick_tile(n, target):
    """Largest divisor of n that is <= target and sublane aligned (mult. of 8),
    falling back to the full extent (a full-extent block is always legal)."""
    if n <= target:
        return n
    start = target - (target % 8)
    for t in range(start, 7, -8):
        if n % t == 0:
            return t
    return n


def _flash_attn_kernel(q_ref, k_ref, v_ref, o_ref, m_sc, l_sc, acc_sc, *, scale):
    """One (batch, q_tile, kv_tile) grid step of online-softmax attention."""
    kv = pl.program_id(2)

    @pl.when(kv == 0)
    def _init():
        m_sc[...] = jnp.full(m_sc.shape, -jnp.inf, dtype=m_sc.dtype)
        l_sc[...] = jnp.zeros(l_sc.shape, dtype=l_sc.dtype)
        acc_sc[...] = jnp.zeros(acc_sc.shape, dtype=acc_sc.dtype)

    # Blocks are (1, tile, d); drop the leading batch dim.
    q = q_ref[0] * scale          # [tq, d]  scale folded into q (len_q*d muls)
    k = k_ref[0]                  # [tk, d]
    v = v_ref[0]                  # [tk, dv]

    # scores: contract on the last axes of q and k (no transpose materialized),
    # native-dtype operands (bf16 goes straight to the MXU), f32 accumulate.
    s = jax.lax.dot_general(
        q, k, (((1,), (1,)), ((), ())),
        preferred_element_type=jnp.float32)              # [tq, tk] f32

    # online (streaming) softmax update, all f32
    m_prev = m_sc[...]
    m_new = jnp.maximum(m_prev, jnp.max(s, axis=-1, keepdims=True))
    alpha = jnp.exp(m_prev - m_new)                      # [tq, 1]
    p = jnp.exp(s - m_new)                               # [tq, tk]
    l_sc[...] = alpha * l_sc[...] + jnp.sum(p, axis=-1, keepdims=True)
    acc_sc[...] = alpha * acc_sc[...] + jnp.dot(
        p.astype(v.dtype), v, preferred_element_type=jnp.float32)
    m_sc[...] = m_new

    @pl.when(kv == pl.num_programs(2) - 1)
    def _finalize():
        # Normalize AFTER the PV matmul: len_q*d_v multiplies, EUP reciprocal.
        inv_l = pl.reciprocal(l_sc[...], approx=True)
        o_ref[0] = (acc_sc[...] * inv_l).astype(o_ref.dtype)


def scaled_dot_prod_attn(q, k, v, *, d_model, q_tile=256, kv_tile=512):
    """softmax(q @ k^T / sqrt(d_model)) @ v, batched over the leading axis."""
    batch_q, len_q, d_q = q.shape
    batch_k, len_k, d_k = k.shape
    batch_v, len_v, d_v = v.shape
    assert batch_q == batch_k and batch_q == batch_v
    assert d_q == d_k and len_k == len_v

    scale = 1.0 / (float(d_model) ** 0.5)

    tq = _pick_tile(len_q, q_tile)
    tk = _pick_tile(len_k, kv_tile)
    n_q = len_q // tq
    n_kv = len_k // tk

    kernel = functools.partial(_flash_attn_kernel, scale=scale)

    # Advisory cost estimate for the XLA scheduler.
    itm = q.dtype.itemsize
    flops = 2 * batch_q * len_q * len_k * (d_q + d_v)
    bytes_accessed = ((batch_q * len_q * d_q + batch_q * len_k * d_k
                       + batch_q * len_k * d_v + batch_q * len_q * d_v) * itm)
    cost = pl.CostEstimate(flops=flops,
                           transcendentals=batch_q * len_q * len_k,
                           bytes_accessed=bytes_accessed)

    # Explicit VMEM budget: double-buffered I/O tiles + f32 accumulators,
    # with generous headroom, clamped to v7x's 64 MiB physical VMEM.
    io_bytes = 2 * (tq * d_q + tk * d_k + tk * d_v + tq * d_v) * itm
    scratch_bytes = (2 * tq * 128 + tq * max(d_v, 128)) * 4
    vmem_limit = int(min(64 << 20, max(4 << 20, 2 * (io_bytes + scratch_bytes))))

    out = pl.pallas_call(
        kernel,
        out_shape=jax.ShapeDtypeStruct((batch_q, len_q, d_v), q.dtype),
        grid_spec=pltpu.PrefetchScalarGridSpec(
            num_scalar_prefetch=0,
            grid=(batch_q, n_q, n_kv),
            in_specs=[
                pl.BlockSpec((1, tq, d_q), lambda b, qi, ki: (b, qi, 0)),
                pl.BlockSpec((1, tk, d_k), lambda b, qi, ki: (b, ki, 0)),
                pl.BlockSpec((1, tk, d_v), lambda b, qi, ki: (b, ki, 0)),
            ],
            out_specs=pl.BlockSpec((1, tq, d_v), lambda b, qi, ki: (b, qi, 0)),
            scratch_shapes=[
                pltpu.VMEM((tq, 1), jnp.float32),    # running max m
                pltpu.VMEM((tq, 1), jnp.float32),    # running denom l
                pltpu.VMEM((tq, d_v), jnp.float32),  # running numerator acc
            ],
        ),
        compiler_params=pltpu.CompilerParams(
            dimension_semantics=("parallel", "parallel", "arbitrary"),
            vmem_limit_bytes=vmem_limit,
        ),
        cost_estimate=cost,
    )(q, k, v)
    return out


def _reference(q, k, v, d_model):
    s = jnp.einsum("bqd,bkd->bqk", q, k) / jnp.sqrt(jnp.float32(d_model))
    p = jax.nn.softmax(s, axis=-1)
    return jnp.einsum("bqk,bkd->bqd", p, v)


if __name__ == "__main__":
    # Small shapes consistent with the module's forward:
    #   batch (= n_heads * batch_size) = 8, len_q = len_k = len_v = 16,
    #   d_q = d_k = d_model = 32, d_v = 32.
    key = jax.random.PRNGKey(0)
    kq, kk, kv = jax.random.split(key, 3)
    B, LQ, LK, D, DV = 8, 16, 16, 32, 32
    d_model = D  # hparams.d_model

    q = jax.random.normal(kq, (B, LQ, D), dtype=jnp.float32)
    k = jax.random.normal(kk, (B, LK, D), dtype=jnp.float32)
    v = jax.random.normal(kv, (B, LK, DV), dtype=jnp.float32)

    out = scaled_dot_prod_attn(q, k, v, d_model=d_model)
    out = jax.block_until_ready(out)

    ref = _reference(q, k, v, d_model)
    assert out.shape == (B, LQ, DV)
    # approx=True reciprocal on the final normalization -> ~1e-4 rel error
    assert jnp.allclose(out, ref, atol=2e-3, rtol=2e-3), (
        float(jnp.max(jnp.abs(out - ref))))

    # bf16 path: operands flow straight to the MXU with f32 accumulation.
    out_bf16 = scaled_dot_prod_attn(q.astype(jnp.bfloat16),
                                    k.astype(jnp.bfloat16),
                                    v.astype(jnp.bfloat16),
                                    d_model=d_model)
    out_bf16 = jax.block_until_ready(out_bf16)
    assert out_bf16.shape == (B, LQ, DV)
    assert bool(jnp.all(jnp.isfinite(out_bf16.astype(jnp.float32))))

    print("KERNEL_OK")
</pallas_src>

<mosaic_0001>
module attributes {stable_mosaic.version = 11 : i64} {
  func.func @_flash_attn_kernel(%arg0: i32, %arg1: i32, %arg2: i32, %arg3: memref<1x16x32xf32, #tpu.memory_space<vmem>>, %arg4: memref<1x16x32xf32, #tpu.memory_space<vmem>>, %arg5: memref<1x16x32xf32, #tpu.memory_space<vmem>>, %arg6: memref<1x16x32xf32, #tpu.memory_space<vmem>>, %arg7: memref<16x1xf32, #tpu.memory_space<vmem>>, %arg8: memref<16x1xf32, #tpu.memory_space<vmem>>, %arg9: memref<16x32xf32, #tpu.memory_space<vmem>>) attributes {dimension_semantics = [#tpu.dimension_semantics<parallel>, #tpu.dimension_semantics<parallel>, #tpu.dimension_semantics<arbitrary>], iteration_bounds = array<i64: 8, 1, 1>, scalar_prefetch = 0 : i64, scratch_operands = 3 : i64, tpu.core_type = #tpu.core_type<tc>, window_params = [{transform_indices = @transform_0, window_bounds = array<i64: 1, 16, 32>}, {transform_indices = @transform_1, window_bounds = array<i64: 1, 16, 32>}, {transform_indices = @transform_2, window_bounds = array<i64: 1, 16, 32>}, {transform_indices = @transform_3, window_bounds = array<i64: 1, 16, 32>}]} {
    %c0_i32 = arith.constant 0 : i32
    %0 = arith.cmpi eq, %arg2, %c0_i32 : i32
    %1 = arith.extui %0 : i1 to i32
    %c0_i32_0 = arith.constant 0 : i32
    %2 = arith.cmpi ne, %1, %c0_i32_0 : i32
    scf.if %2 {
      %cst_27 = arith.constant 0xFF800000 : f32
      %37 = vector.broadcast %cst_27 : f32 to vector<16x1xf32>
      %c0_28 = arith.constant 0 : index
      %c0_29 = arith.constant 0 : index
      %38 = vector.load %arg7[%c0_28, %c0_29] : memref<16x1xf32, #tpu.memory_space<vmem>>, vector<16x1xf32>
      tpu.vector_store %arg7[%c0_28, %c0_29], %37 {strides = array<i32>} : memref<16x1xf32, #tpu.memory_space<vmem>>, vector<16x1xf32>,
      %cst_30 = arith.constant 0.000000e+00 : f32
      %39 = vector.broadcast %cst_30 : f32 to vector<16x1xf32>
      %c0_31 = arith.constant 0 : index
      %c0_32 = arith.constant 0 : index
      %40 = vector.load %arg8[%c0_31, %c0_32] : memref<16x1xf32, #tpu.memory_space<vmem>>, vector<16x1xf32>
      tpu.vector_store %arg8[%c0_31, %c0_32], %39 {strides = array<i32>} : memref<16x1xf32, #tpu.memory_space<vmem>>, vector<16x1xf32>,
      %cst_33 = arith.constant 0.000000e+00 : f32
      %41 = vector.broadcast %cst_33 : f32 to vector<16x32xf32>
      %c0_34 = arith.constant 0 : index
      %c0_35 = arith.constant 0 : index
      %42 = vector.load %arg9[%c0_34, %c0_35] : memref<16x32xf32, #tpu.memory_space<vmem>>, vector<16x32xf32>
      tpu.vector_store %arg9[%c0_34, %c0_35], %41 {strides = array<i32>} : memref<16x32xf32, #tpu.memory_space<vmem>>, vector<16x32xf32>,
    } else {
    }
    %c0 = arith.constant 0 : index
    %c0_1 = arith.constant 0 : index
    %c0_2 = arith.constant 0 : index
    %3 = vector.load %arg3[%c0, %c0_1, %c0_2] : memref<1x16x32xf32, #tpu.memory_space<vmem>>, vector<1x16x32xf32>
    %4 = vector.shape_cast %3 : vector<1x16x32xf32> to vector<16x32xf32>
    %cst = arith.constant 0.176776692 : f32
    %5 = vector.broadcast %cst : f32 to vector<16x32xf32>
    %6 = arith.mulf %4, %5 : vector<16x32xf32>
    %c0_3 = arith.constant 0 : index
    %c0_4 = arith.constant 0 : index
    %c0_5 = arith.constant 0 : index
    %7 = vector.load %arg4[%c0_3, %c0_4, %c0_5] : memref<1x16x32xf32, #tpu.memory_space<vmem>>, vector<1x16x32xf32>
    %8 = vector.shape_cast %7 : vector<1x16x32xf32> to vector<16x32xf32>
    %c0_6 = arith.constant 0 : index
    %c0_7 = arith.constant 0 : index
    %c0_8 = arith.constant 0 : index
    %9 = vector.load %arg5[%c0_6, %c0_7, %c0_8] : memref<1x16x32xf32, #tpu.memory_space<vmem>>, vector<1x16x32xf32>
    %10 = vector.shape_cast %9 : vector<1x16x32xf32> to vector<16x32xf32>
    %cst_9 = arith.constant dense<0.000000e+00> : vector<16x16xf32>
    %11 = tpu.matmul %6, %8, %cst_9 {dimension_numbers = #tpu.dot_dimension_numbers<[1], [1], [0], [0], [0, 0, 1, 0], [], []>} : vector<16x32xf32>, vector<16x32xf32>, vector<16x16xf32> -> vector<16x16xf32>
    %c0_10 = arith.constant 0 : index
    %c0_11 = arith.constant 0 : index
    %12 = vector.load %arg7[%c0_10, %c0_11] : memref<16x1xf32, #tpu.memory_space<vmem>>, vector<16x1xf32>
    %cst_12 = arith.constant dense<0xFF800000> : vector<16xf32>
    %13 = vector.multi_reduction <maximumf>, %11, %cst_12 [1] : vector<16x16xf32> to vector<16xf32>
    %14 = vector.shape_cast %13 : vector<16xf32> to vector<16x1xf32>
    %15 = arith.maximumf %12, %14 : vector<16x1xf32>
    %16 = arith.subf %12, %15 : vector<16x1xf32>
    %17 = math.exp %16 : vector<16x1xf32>
    %18 = vector.broadcast %15 : vector<16x1xf32> to vector<16x16xf32>
    %19 = arith.subf %11, %18 : vector<16x16xf32>
    %20 = math.exp %19 : vector<16x16xf32>
    %c0_13 = arith.constant 0 : index
    %c0_14 = arith.constant 0 : index
    %21 = vector.load %arg8[%c0_13, %c0_14] : memref<16x1xf32, #tpu.memory_space<vmem>>, vector<16x1xf32>
    %22 = arith.mulf %17, %21 : vector<16x1xf32>
    %cst_15 = arith.constant dense<0.000000e+00> : vector<16xf32>
    %23 = vector.multi_reduction <add>, %20, %cst_15 [1] : vector<16x16xf32> to vector<16xf32>
    %24 = vector.shape_cast %23 : vector<16xf32> to vector<16x1xf32>
    %25 = arith.addf %22, %24 : vector<16x1xf32>
    %c0_16 = arith.constant 0 : index
    %c0_17 = arith.constant 0 : index
    %26 = vector.load %arg8[%c0_16, %c0_17] : memref<16x1xf32, #tpu.memory_space<vmem>>, vector<16x1xf32>
    tpu.vector_store %arg8[%c0_16, %c0_17], %25 {strides = array<i32>} : memref<16x1xf32, #tpu.memory_space<vmem>>, vector<16x1xf32>,
    %c0_18 = arith.constant 0 : index
    %c0_19 = arith.constant 0 : index
    %27 = vector.load %arg9[%c0_18, %c0_19] : memref<16x32xf32, #tpu.memory_space<vmem>>, vector<16x32xf32>
    %28 = vector.broadcast %17 : vector<16x1xf32> to vector<16x32xf32>
    %29 = arith.mulf %28, %27 : vector<16x32xf32>
    %cst_20 = arith.constant dense<0.000000e+00> : vector<16x32xf32>
    %30 = tpu.matmul %20, %10, %cst_20 {dimension_numbers = #tpu.dot_dimension_numbers<[1], [0], [0], [1], [0, 0, 1, 1], [], []>} : vector<16x16xf32>, vector<16x32xf32>, vector<16x32xf32> -> vector<16x32xf32>
    %31 = arith.addf %29, %30 : vector<16x32xf32>
    %c0_21 = arith.constant 0 : index
    %c0_22 = arith.constant 0 : index
    %32 = vector.load %arg9[%c0_21, %c0_22] : memref<16x32xf32, #tpu.memory_space<vmem>>, vector<16x32xf32>
    tpu.vector_store %arg9[%c0_21, %c0_22], %31 {strides = array<i32>} : memref<16x32xf32, #tpu.memory_space<vmem>>, vector<16x32xf32>,
    %c0_23 = arith.constant 0 : index
    %c0_24 = arith.constant 0 : index
    %33 = vector.load %arg7[%c0_23, %c0_24] : memref<16x1xf32, #tpu.memory_space<vmem>>, vector<16x1xf32>
    tpu.vector_store %arg7[%c0_23, %c0_24], %15 {strides = array<i32>} : memref<16x1xf32, #tpu.memory_space<vmem>>, vector<16x1xf32>,
    %c0_i32_25 = arith.constant 0 : i32
    %34 = arith.cmpi eq, %arg2, %c0_i32_25 : i32
    %35 = arith.extui %34 : i1 to i32
    %c0_i32_26 = arith.constant 0 : i32
    %36 = arith.cmpi ne, %35, %c0_i32_26 : i32
    scf.if %36 {
      %c0_27 = arith.constant 0 : index
      %c0_28 = arith.constant 0 : index
      %37 = vector.load %arg8[%c0_27, %c0_28] : memref<16x1xf32, #tpu.memory_space<vmem>>, vector<16x1xf32>
      %38 = tpu.reciprocal %37 {approx = true} : vector<16x1xf32> -> vector<16x1xf32>
      %c0_29 = arith.constant 0 : index
      %c0_30 = arith.constant 0 : index
      %39 = vector.load %arg9[%c0_29, %c0_30] : memref<16x32xf32, #tpu.memory_space<vmem>>, vector<16x32xf32>
      %40 = vector.broadcast %38 : vector<16x1xf32> to vector<16x32xf32>
      %41 = arith.mulf %39, %40 : vector<16x32xf32>
      %c0_31 = arith.constant 0 : index
      %c0_32 = arith.constant 0 : index
      %c0_33 = arith.constant 0 : index
      %42 = vector.load %arg6[%c0_31, %c0_32, %c0_33] : memref<1x16x32xf32, #tpu.memory_space<vmem>>, vector<1x16x32xf32>
      %43 = vector.shape_cast %42 : vector<1x16x32xf32> to vector<16x32xf32>
      %44 = vector.shape_cast %41 : vector<16x32xf32> to vector<1x16x32xf32>
      tpu.vector_store %arg6[%c0_31, %c0_32, %c0_33], %44 {strides = array<i32>} : memref<1x16x32xf32, #tpu.memory_space<vmem>>, vector<1x16x32xf32>,
    } else {
    }
    return
  }
  func.func @transform_0(%arg0: i32, %arg1: i32, %arg2: i32) -> (i32, i32, i32) {
    %c0_i32 = arith.constant 0 : i32
    %c0_i32_0 = arith.constant 0 : i32
    return %arg0, %arg1, %c0_i32 : i32, i32, i32
  }
  func.func @transform_1(%arg0: i32, %arg1: i32, %arg2: i32) -> (i32, i32, i32) {
    %c0_i32 = arith.constant 0 : i32
    %c0_i32_0 = arith.constant 0 : i32
    return %arg0, %arg2, %c0_i32 : i32, i32, i32
  }
  func.func @transform_2(%arg0: i32, %arg1: i32, %arg2: i32) -> (i32, i32, i32) {
    %c0_i32 = arith.constant 0 : i32
    %c0_i32_0 = arith.constant 0 : i32
    return %arg0, %arg2, %c0_i32 : i32, i32, i32
  }
  func.func @transform_3(%arg0: i32, %arg1: i32, %arg2: i32) -> (i32, i32, i32) {
    %c0_i32 = arith.constant 0 : i32
    %c0_i32_0 = arith.constant 0 : i32
    return %arg0, %arg1, %c0_i32 : i32, i32, i32
  }
}

</mosaic_0001>

<bundles_post_ra>
// kernel: tpu_custom_call.1
= control target key start
LH: loop header
LB: loop body
LE: loop exit
PB: predicated region body
PF: predicated region fallthrough
CT: control target
= control target key end

     0   :  { %s1411_s0 = inlined_call_operand.hbm [shape: f32[8,16,32], index: 0, kind: input, shape index: {}]   ;;  %s1412_s1 = inlined_call_operand.hbm [shape: f32[8,16,32], index: 1, kind: input, shape index: {}]   ;;  %s1413_s2 = inlined_call_operand.hbm [shape: f32[8,16,32], index: 2, kind: input, shape index: {}]   ;;  %s1414_s3 = inlined_call_operand.hbm [shape: f32[8,16,32], index: 3, kind: output, shape index: {}]  }
   0x1   :  { %1424 = sst [smem:[#allocation18_spill]] %s1412_s1 }
   0x2   :  { %8 = vsyncpa [#allocation6], 0 }
   0x3   :  { %10 = vsyncpa [#allocation6 + $0x1], 0 }
   0x4   :  { %11 = vsyncpa [#allocation9], 0 }
   0x5   :  { %13 = vsyncpa [#allocation9 + $0x1], 0 }
   0x6   :  { %14 = vsyncpa [#allocation7], 0 }
   0x7   :  { %16 = vsyncpa [#allocation7 + $0x1], 0  ;;  %s1105_s12 = smov 0   ;;  %s1107_s13 = smov 0  }
   0x8   :  { %s1109_s14 = smov 0   ;;  %s1111_s15 = smov 0  }
   0x9   :  { %s1113_s16 = smov 0   ;;  %s1115_s17 = smov 0  }
   0xa LB: > { %1425 = sst [smem:[#allocation15_spill]] %s1068_s16  ;;  %s1136_s18 = sadd.s32 4294967295, %s1072_s17   ;;  %s1072_s17 = sphi %s1115_s17, %s22_s17   ;;  %s1068_s16 = sphi %s1113_s16, %s1447_s16   ;;  %s1064_s15 = sphi %s1111_s15, %s1446_s15   ;;  %s1060_s14 = sphi %s1109_s14, %s1450_s14   ;;  %s1056_s13 = sphi %s1107_s13, %s1449_s13   ;;  %s1052_s12 = sphi %s1105_s12, %s1448_s12  }
   0xb   : > { %s739_s19 = sadd.s32 4294967294, %s1072_s17   ;;  %s41_s20 = sadd.s32 1, %s1068_s16 }
   0xc   : > { %s50_s21 = sadd.s32 1, %s1060_s14  ;;  %p43_p0 = scmp.ge.s32.totalorder %s41_s20, 8 }
   0xd   : > { %p57_p1 = scmp.ne.s32.totalorder %s1060_s14, %s1056_s13  ;;  %p58_p2 = scmp.eq.s32.totalorder %s1072_s17, 0 }
   0xe   : > { %p63_p3 = scmp.ne.s32.totalorder %s1056_s13, %s1052_s12  ;;  %s1452_s20 = smov (%p43_p0, %s41_s20), 0 }
   0xf   : > { %1426 = sst [smem:[#allocation16_spill]] %s1452_s20  ;;  %p1148_p4 = por %p58_p2, %p57_p1 }
  0x10   : > { %p64_p5 = scmp.eq.s32.totalorder %s1136_s18, 0  ;;  %s45_s23 = ssub.s32 %s1068_s16, %s1452_s20 }
  0x11   : > { %p145_p6 = scmp.eq.s32.totalorder %s1136_s18, 7  ;;  %p48_p7 = scmp.eq.s32.totalorder %s45_s23, 0 }
  0x12   : > { %p1156_p8 = por %p64_p5, %p63_p3  ;;  %p151_p10 = scmp.eq.s32.totalorder %s739_s19, 7 }
  0x13   : > { %p1160_p9 = por %p145_p6, %p57_p1  ;;  %p825_p12 = scmp.lt.s32.totalorder %s1072_s17, 8 }
  0x14   : > { %s1428_s24 = scalar_select %p1156_p8, 1, 0 }
  0x15   : > { %s1429_s25 = scalar_select %p1160_p9, 1, 0 }
  0x16   : > { %s1165_s26 = scalar_select %p48_p7, %s1060_s14, %s50_s21  }
  0x17   : > { %p1167_p11 = por %p151_p10, %p63_p3  ;;  %s1417_s28 = sand.u32 1, %s1060_s14  }
  0x18   : > { %1430 = sst [smem:[#allocation17_spill]] %s1165_s26  ;;  %s1175_s29 = sshll.u32 %s1417_s28, 4 }
  0x19   : > { %s1431_s27 = scalar_select %p1167_p11, 1, 0 }
  0x1a   : > { %s1178_s30 = sshll.u32 %s1068_s16, 8  ;;  %p1182_p13 = pnand %p825_p12, %p1148_p4 }
  0x1b   : > { %s194_s5 = sand.u32 1, %s1072_s17   ;;  %s1433_s1 = sld [smem:[#allocation18_spill]] }
  0x1c   : > { %s198_s9 = scalar_lea.vmem [#allocation8], %s1175_s29  ;;  %s1198_s11 = scalar_lea.sflag [#allocation9], %s194_s5 }
  0x1d   : > { %s207_s10 = sshll.u32 %s198_s9, 4  ;;  %p1204_p3 = pneg %p1182_p13  ;;  %s1195_s10 = int_to_ptr.vmem [resolvable:$true] %s207_s10 }
  0x21   : > { %s1191_s8 = scalar_lea.hbm %s1433_s1, %s1178_s30  ;;  %s901_s6 = scalar_lea.hbm %s1433_s1, 2048 }
  0x22   : > { %s896_s19 = scalar_lea.hbm %s1191_s8, 256  ;;  %p902_p6 = scmp.lt.u32.totalorder %s1191_s8, %s1433_s1 }
  0x23   : > { %p897_p2 = scmp.ne.s32.totalorder %s1191_s8, %s896_s19  ;;  %p903_p7 = scmp.lt.u32.totalorder %s901_s6, %s896_s19 }
  0x24   : > { %p905_p12 = scmp.lt.u32.totalorder %s896_s19, %s1191_s8 }
  0x25   : > { %p899_p4 = pnand %p1204_p3, %p897_p2  ;;  %p904_p10 = por %p903_p7, %p902_p6 }
  0x27   : > { %p900_p5 = pneg %p899_p4  ;;  %p906_p0 = por %p905_p12, %p904_p10 }
  0x29   : > { %p907_p1 = pnand %p906_p0, %p900_p5 }
  0x2b   : > { %910 = shalt.err (!%p907_p1)
}
  0x2c   : > { %s911_s5 = scalar_lea.vmem %s1195_s10, 256  ;;  %s1074_s22 = smov [#allocation8]  }
  0x2d   : > { %p912_p2 = scmp.ne.s32.totalorder %s1195_s10, %s911_s5  ;;  %s916_s23 = sshll.u32 %s1074_s22, 4  ;;  %s917_s23 = int_to_ptr.vmem [resolvable:$false] %s916_s23 }
  0x2e   : > { %s918_s7 = scalar_lea.vmem %s917_s23, 512  ;;  %p919_p9 = scmp.lt.s32.totalorder %s1195_s10, %s917_s23 }
  0x2f   : > { %p914_p4 = pnand %p912_p2, %p1204_p3  ;;  %p920_p8 = scmp.lt.s32.totalorder %s918_s7, %s911_s5 }
  0x31   : > { %p915_p11 = pneg %p914_p4  ;;  %p921_p6 = por %p920_p8, %p919_p9 }
  0x33   : > { %p922_p7 = pnand %p921_p6, %p915_p11 }
  0x35   : > { %925 = shalt.err (!%p922_p7)
}
  0x36   : > { %s1418_s19 = smov 128   ;;  %s1420_s6 = smov 8  }
  0x37   : > { %817 = dma.hbm_to_vmem [thread:$0]  (!%p1182_p13), %s1191_s8, 256, %s1195_s10, %s1198_s11, %s1418_s19, %s1418_s19, %s1420_s6  }
  0x38   : > { %p1435_p8 = scmp.lt.s32.totalorder %s1072_s17, 9  ;;  %p1436_p9 = scmp.ge.s32.totalorder %s1072_s17, 1 }
  0x39   : > { %s1243_s23 = scalar_lea.hbm %s1411_s0, %s1178_s30  ;;  %s175_s7 = scalar_lea.vmem [#allocation5], %s1175_s29 }
  0x3a   : > { %p1235_p11 = pnand %p1436_p9, %p1435_p8  ;;  %s184_s28 = sshll.u32 %s175_s7, 4  ;;  %s1246_s28 = int_to_ptr.vmem [resolvable:$true] %s184_s28 }
  0x3b   : > { %s1252_s19 = scalar_lea.hbm %s1413_s2, %s1178_s30  ;;  %s1438_s6 = sand.u32 1, %s1060_s14  }
  0x3c   : > { %s1437_s9 = scalar_select %p1235_p11, 1, 0 }
  0x3d   : > { %s1256_s1 = scalar_lea.sflag [#allocation6], %s1438_s6  ;;  %s926_s20 = scalar_lea.hbm %s1243_s23, 256 }
  0x3e   : > { %p927_p0 = scmp.ne.s32.totalorder %s1243_s23, %s926_s20  ;;  %s931_s16 = scalar_lea.hbm %s1411_s0, 2048 }
  0x3f   : > { %p932_p10 = scmp.lt.u32.totalorder %s1243_s23, %s1411_s0  ;;  %p933_p12 = scmp.lt.u32.totalorder %s931_s16, %s926_s20 }
  0x40   : > { %p929_p1 = pnand %p927_p0, %p1204_p3  ;;  %p935_p4 = scmp.lt.u32.totalorder %s926_s20, %s1243_s23 }
  0x41   : > { %p934_p2 = por %p933_p12, %p932_p10 }
  0x42   : > { %p930_p5 = pneg %p929_p1 }
  0x43   : > { %p936_p6 = por %p935_p4, %p934_p2 }
  0x45   : > { %p937_p7 = pnand %p936_p6, %p930_p5 }
  0x47   : > { %940 = shalt.err (!%p937_p7)
}
  0x48   : > { %s941_s30 = scalar_lea.vmem %s1246_s28, 256  ;;  %s1077_s6 = smov [#allocation5]  }
  0x49   : > { %p942_p8 = scmp.ne.s32.totalorder %s1246_s28, %s941_s30  ;;  %s946_s8 = sshll.u32 %s1077_s6, 4  ;;  %s947_s8 = int_to_ptr.vmem [resolvable:$false] %s946_s8 }
  0x4a   : > { %s948_s26 = scalar_lea.vmem %s947_s8, 512  ;;  %p949_p1 = scmp.lt.s32.totalorder %s1246_s28, %s947_s8 }
  0x4b   : > { %p944_p9 = pnand %p942_p8, %p1204_p3  ;;  %p950_p11 = scmp.lt.s32.totalorder %s948_s26, %s941_s30 }
  0x4d   : > { %p945_p0 = pneg %p944_p9  ;;  %p951_p10 = por %p950_p11, %p949_p1 }
  0x4f   : > { %p952_p12 = pnand %p951_p10, %p945_p0 }
  0x51   : > { %955 = shalt.err (!%p952_p12)
}
  0x52   : > { %s1439_s16 = smov 8   ;;  %s1440_s20 = smov 128  }
  0x53   : > { %814 = dma.hbm_to_vmem [thread:$0]  (!%p1182_p13), %s1243_s23, 256, %s1246_s28, %s1256_s1, %s1440_s20, %s1440_s20, %s1439_s16  }
  0x54   : > { %s221_s10 = scalar_lea.vmem [#allocation10], %s1175_s29  ;;  %s956_s22 = scalar_lea.hbm %s1252_s19, 256 }
  0x55   : > { %s230_s5 = sshll.u32 %s221_s10, 4  ;;  %p957_p11 = scmp.ne.s32.totalorder %s1252_s19, %s956_s22  ;;  %s1284_s5 = int_to_ptr.vmem [resolvable:$true] %s230_s5 }
  0x56   : > { %s961_s6 = scalar_lea.hbm %s1413_s2, 2048  ;;  %p962_p4 = scmp.lt.u32.totalorder %s1252_s19, %s1413_s2 }
  0x57   : > { %p959_p5 = pnand %p957_p11, %p1204_p3  ;;  %p963_p6 = scmp.lt.u32.totalorder %s961_s6, %s956_s22 }
  0x58   : > { %p965_p8 = scmp.lt.u32.totalorder %s956_s22, %s1252_s19 }
  0x59   : > { %p960_p2 = pneg %p959_p5  ;;  %p964_p7 = por %p963_p6, %p962_p4 }
  0x5b   : > { %p966_p9 = por %p965_p8, %p964_p7 }
  0x5d   : > { %p967_p0 = pnand %p966_p9, %p960_p2 }
  0x5f   : > { %970 = shalt.err (!%p967_p0)
}
  0x60   : > { %s971_s1 = scalar_lea.vmem %s1284_s5, 256  ;;  %s1078_s28 = smov [#allocation10]  }
  0x61   : > { %p972_p1 = scmp.ne.s32.totalorder %s1284_s5, %s971_s1  ;;  %s976_s29 = sshll.u32 %s1078_s28, 4  ;;  %s977_s29 = int_to_ptr.vmem [resolvable:$false] %s976_s29 }
  0x62   : > { %s978_s23 = scalar_lea.vmem %s977_s29, 512  ;;  %p979_p11 = scmp.lt.s32.totalorder %s1284_s5, %s977_s29 }
  0x63   : > { %p974_p10 = pnand %p972_p1, %p1204_p3  ;;  %p980_p5 = scmp.lt.s32.totalorder %s978_s23, %s971_s1 }
  0x65   : > { %p975_p12 = pneg %p974_p10  ;;  %p981_p4 = por %p980_p5, %p979_p11 }
  0x67   : > { %p982_p6 = pnand %p981_p4, %p975_p12 }
  0x69   : > { %985 = shalt.err (!%p982_p6)
}
  0x6a   : > { %820 = dma.hbm_to_vmem [thread:$0]  (!%p1182_p13), %s1252_s19, 256, %s1284_s5, %s1198_s11, %s1440_s20, %s1440_s20, %s1439_s16  }
  0x6b   : > { %p1441_p3 = scmp.ne.s32.totalorder %s1437_s9, 0 }
  0x6c   : > { %s1314_s21 = sand.u32 (!%p1441_p3), 1, %s1056_s13   ;;  %p1442_p2 = scmp.ne.s32.totalorder (!%p1441_p3), %s1428_s24, 0 }
  0x6d   : > { %242 = sbr.rel (%p1441_p3) target bundleno = 945 (0x3b1), region = 32  ;;  %s1317_s10 = sshll.u32 (!%p1441_p3), %s1314_s21, 4 }
  0x6e   : > { %s245_s4 = scalar_lea.sflag (!%p1441_p3), [#allocation6], %s1314_s21  ;;  %s248_s22 = scalar_lea.vmem (!%p1441_p3), [#allocation5], %s1317_s10 }
  0x74   : > { %1039 = dma.done.wait (%p1442_p2), %s245_s4, 256  }
  0x75   : > { %1041 = vsyncadd (%p1442_p2), %s245_s4, 4294967040  ;;  %s253_s11 = sand.u32 1, %s1136_s18   ;;  %s257_s9 = scalar_lea.vmem [#allocation8], %s1317_s10 }
  0x76   : > { %s254_s19 = scalar_lea.sflag [#allocation9], %s253_s11 }
  0x77   : > { %1043 = dma.done.wait (%p1442_p2), %s254_s19, 512  }
  0x78   : > { %1045 = vsyncadd (%p1442_p2), %s254_s19, 4294966784  ;;  %vm312_vm0 = vcmask 261120   ;;  %v319_v0 = vld [vmem:[%s257_s9] sm:$0xff]  ;;  %v320_v1 = vld [vmem:[%s257_s9 + $0x8] sm:$0xff]  ;;  %vm307_vm2 = vcmask 7168   ;;  %v1079_v7 = vmov -inf  }
  0x79   : > { %vm794_vm1 = vmpackc.low %vm312_vm0, %vm312_vm0  ;;  %v315_v2 = vld [vmem:[%s248_s22] sm:$0xff]  ;;  %v793_v3 = vpack.c.bf16 %v320_v1, %v319_v0  ;;  %v316_v5 = vld [vmem:[%s248_s22 + $0x8] sm:$0xff]  ;;  %308 = vst.msk [vmem:[#allocation2] sm:$0xff] %vm307_vm2, %v1079_v7  ;;  %vm413_vm3 = vcmask 130048   ;;  %v1080_v12 = vmov 0   ;;  %v1081_v13 = vmov 0.0  }
  0x7a   : > { %v317_v4 = vmul.f32 0.17677669, %v315_v2  ;;  %v318_v6 = vmul.f32 0.17677669, %v316_v5  ;;  %309 = vst.msk [vmem:[#allocation2 + $0x8] sm:$0xff] %vm307_vm2, %v1079_v7  ;;  %882 = vset.pattern.permute.xlu1 %v1080_v12  ;;  %883 = vset.pattern.permute.xlu0 %v1080_v12  ;;  %310 = vst.msk [vmem:[#allocation3] sm:$0xff] %vm307_vm2, %v1081_v13 }
  0x7b   : > { %795 = vmatprep.subr.msk.bf16.mxu0 %vm794_vm1, %v793_v3  ;;  %313 = vst.msk [vmem:[#allocation4] sm:$0xff] %vm312_vm0, %v1081_v13  ;;  %314 = vst.msk [vmem:[#allocation4 + $0x8] sm:$0xff] %vm312_vm0, %v1081_v13  ;;  %s266_s18 = scalar_lea.vmem [#allocation10], %s1317_s10  ;;  %s298_s24 = scalar_lea.vmem [#allocation11], %s1317_s10 }
  0x7c   : > { %783 = vmatprep.mubr.msk.f32.mxu0 %vm312_vm0, %v317_v4  ;;  %798 = vmatpush3.bf16.xpose.msk.msra.mxu0 %vm794_vm1, %v793_v3  ;;  %311 = vst.msk [vmem:[#allocation3 + $0x8] sm:$0xff] %vm307_vm2, %v1081_v13  ;;  %v321_v22 = vld [vmem:[%s266_s18] sm:$0xff]  ;;  %v322_v23 = vld [vmem:[%s266_s18 + $0x8] sm:$0xff]  ;;  %s599_s16 = sshll.u32 %s298_s24, 4  ;;  %s770_s20 = sshll.u32 %s1064_s15, 8  ;;  %s1356_s16 = int_to_ptr.vmem [resolvable:$true] %s599_s16 }
  0x7d   : > { %v799_v24 = vpack.c.bf16 %v322_v23, %v321_v22  ;;  %s1362_s30 = scalar_lea.hbm %s1414_s3, %s770_s20  ;;  %s584_s6 = scalar_lea.sflag [#allocation7], %s1314_s21 }
  0x7e   : > { %s986_s8 = scalar_lea.vmem %s1356_s16, 256  ;;  %p1443_p7 = scmp.ne.s32.totalorder %s1429_s25, 0 }
  0x7f   : > { %800 = vmatprep.subr.bf16.mxu1 %v799_v24  ;;  %p987_p13 = scmp.ne.s32.totalorder %s1356_s16, %s986_s8  ;;  %s1082_s15 = smov [#allocation11]  }
  0x80   : > { %v411_v14 = vld [vmem:[#allocation2] sm:$0xff]  ;;  %802 = vmatpush3.bf16.msra.mxu1 %v799_v24  ;;  %s990_s26 = sshll.u32 %s1082_s15, 4  ;;  %s991_s26 = int_to_ptr.vmem [resolvable:$false] %s990_s26 }
  0x81   : > { %v412_v17 = vld [vmem:[#allocation2 + $0x8] sm:$0xff]  ;;  %v444_v39 = vld [vmem:[#allocation3] sm:$0xff]  ;;  %p988_p8 = pnand %p987_p13, %p1443_p7  ;;  %s992_s1 = scalar_lea.vmem %s991_s26, 512 }
  0x82   : > { %v460_v51 = vld [vmem:[#allocation4 + $0x8] sm:$0xff]  ;;  %v459_v53 = vld [vmem:[#allocation4] sm:$0xff]  ;;  %p993_p0 = scmp.lt.s32.totalorder %s1356_s16, %s991_s26  ;;  %p994_p1 = scmp.lt.s32.totalorder %s992_s1, %s986_s8 }
  0x83   : > { %784 = vmatmul.mubr.msk.f32.vlgmr.msra.gmra.mrb[0].mxu0 %vm312_vm0, %v318_v6  ;;  %v445_v42 = vld [vmem:[#allocation3 + $0x8] sm:$0xff]  ;;  %p989_p9 = pneg %p988_p8 }
  0x84   : > { %p995_p10 = por %p994_p1, %p993_p0 }
  0x86   : > { %p996_p12 = pnand %p995_p10, %p989_p9 }
 0x156   : > { %v785_v8 = vpop.f32.mrb[0].mxu0 }
 0x157   : > { %v402_v9 = vpop.f32.mrb[1].mxu0  ;;  %v417_v11 = vsel %vm413_vm3, %v785_v8, -inf }
 0x158   : > { %v414_v10 = vsel %vm413_vm3, %v402_v9, -inf }
 0x159   : > { %415 = vmax.xlane.f32.xlu0 %v414_v10 }
 0x15d   : > { %418 = vmax.xlane.f32.xlu0 %v417_v11 }
 0x1e6   : > { %v416_v15 = vpop.xlane.xlu0 %415 }
 0x1e7   : > { %v420_v16 = vmax.f32 %v411_v14, %v416_v15 }
 0x1e9   : > { %v422_v18 = vsub.f32 %v411_v14, %v420_v16  ;;  %558 = vst.msk [vmem:[#allocation2] sm:$0xff] %vm307_vm2, %v420_v16  ;;  %430 = vperm.xlu1 %882, %v420_v16  }
 0x1ea   : > { %v419_v19 = vpop.xlane.xlu0 %418 }
 0x1eb   : > { %v421_v20 = vmax.f32 %v412_v17, %v419_v19  ;;  %v424_v36 = vmul.f32 1.442695, %v422_v18 }
 0x1ed   : > { %v423_v21 = vsub.f32 %v412_v17, %v421_v20  ;;  %559 = vst.msk [vmem:[#allocation2 + $0x8] sm:$0xff] %vm307_vm2, %v421_v20  ;;  %435 = vperm.xlu1 %882, %v421_v20  }
 0x1ef   : > { %v426_v35 = vmul.f32 1.442695, %v423_v21 }
 0x268   : > { %v431_v25 = vpop.permute.xlu1 %430 }
 0x269   : > { %v438_v26 = vsub.f32 %v402_v9, %v431_v25 }
 0x26b   : > { %v440_v27 = vmul.f32 1.442695, %v438_v26 }
 0x26c   : > { %v436_v28 = vpop.permute.xlu1 %435 }
 0x26d   : > { %884 = vpow2.f32 %v440_v27  ;;  %v439_v29 = vsub.f32 %v785_v8, %v436_v28 }
 0x26f   : > { %v442_v30 = vmul.f32 1.442695, %v439_v29 }
 0x271   : > { %886 = vpow2.f32 %v442_v30 }
 0x272   : > { %888 = vpow2.f32 %v426_v35 }
 0x273   : > { %890 = vpow2.f32 %v424_v36 }
 0x277   : > { %v885_v31 = vpop.eup %884 }
 0x278   : > { %790 = vmatprep.mubr.msk.f32.mxu1 %vm413_vm3, %v885_v31  ;;  %v448_v32 = vsel %vm413_vm3, %v885_v31, 0.0 }
 0x279   : > { %449 = vadd.xlane.f32.xlu0 %v448_v32 }
 0x27b   : > { %v887_v33 = vpop.eup %886 }
 0x27c   : > { %791 = vmatmul.mubr.msk.f32.vlgmr.msra.gmra.mrb[0].mxu1 %vm413_vm3, %v887_v33  ;;  %v451_v34 = vsel %vm413_vm3, %v887_v33, 0.0  ;;  %v889_v37 = vpop.eup %888 }
 0x27d   : > { %452 = vadd.xlane.f32.xlu1 %v451_v34  ;;  %v891_v38 = vpop.eup %890  ;;  %v447_v44 = vmul.f32 %v889_v37, %v445_v42 }
 0x27e   : > { %v446_v40 = vmul.f32 %v891_v38, %v444_v39 }
 0x28e   : > { %468 = vperm.xlu1 %882, %v889_v37  }
 0x28f   : > { %463 = vperm.xlu0 %883, %v891_v38  }
 0x306   : > { %v450_v41 = vpop.xlane.xlu0 %449 }
 0x307   : > { %v454_v43 = vadd.f32 %v450_v41, %v446_v40 }
 0x309   : > { %457 = vst.msk [vmem:[#allocation3] sm:$0xff] %vm307_vm2, %v454_v43 }
 0x30a   : > { %v453_v45 = vpop.xlane.xlu1 %452 }
 0x30b   : > { %v455_v46 = vadd.f32 %v453_v45, %v447_v44 }
 0x30d   : > { %458 = vst.msk [vmem:[#allocation3 + $0x8] sm:$0xff] %vm307_vm2, %v455_v46 }
 0x30e   : > { %v469_v52 = vpop.permute.xlu1 %468  ;;  %v464_v54 = vpop.permute.xlu0 %463 }
 0x30f   : > { %v472_v55 = vmul.f32 %v469_v52, %v460_v51  ;;  %v471_v56 = vmul.f32 %v464_v54, %v459_v53 }
 0x310   : > { %v563_v47 = vld [vmem:[#allocation3] sm:$0xff] }
 0x311   : > { %892 = vrcp.f32 %v563_v47 }
 0x314   : > { %v564_v48 = vld [vmem:[#allocation3 + $0x8] sm:$0xff] }
 0x315   : > { %894 = vrcp.f32 %v564_v48 }
 0x31b   : > { %v893_v49 = vpop.eup %892 }
 0x31c   : > { %571 = vperm.xlu0 %883, %v893_v49  }
 0x31f   : > { %v895_v50 = vpop.eup %894 }
 0x320   : > { %576 = vperm.xlu0 %883, %v895_v50  }
 0x34f   : > { %v792_v57 = vpop.f32.mrb[0].mxu1 }
 0x350   : > { %v555_v58 = vadd.f32 %v792_v57, %v472_v55  ;;  %v545_v59 = vpop.f32.mrb[1].mxu1 }
 0x351   : > { %v554_v60 = vadd.f32 %v545_v59, %v471_v56 }
 0x352   : > { %557 = vst.msk [vmem:[#allocation4 + $0x8] sm:$0xff] %vm312_vm0, %v555_v58 }
 0x353   : > { %556 = vst.msk [vmem:[#allocation4] sm:$0xff] %vm312_vm0, %v554_v60 }
 0x359   : > { %v568_v0 = vld [vmem:[#allocation4 + $0x8] sm:$0xff] }
 0x35a   : > { %v567_v61 = vld [vmem:[#allocation4] sm:$0xff] }
 0x39b   : > { %v572_v62 = vpop.permute.xlu0 %571 }
 0x39c   : > { %v579_v63 = vmul.f32 %v572_v62, %v567_v61 }
 0x39e   : > { %581 = vst.msk [vmem:[%s298_s24] sm:$0xff] %vm312_vm0, %v579_v63 }
 0x39f   : > { %v577_v1 = vpop.permute.xlu0 %576 }
 0x3a0   : > { %v580_v2 = vmul.f32 %v577_v1, %v568_v0 }
 0x3a2   : > { %582 = vst.msk [vmem:[%s298_s24 + $0x8] sm:$0xff] %vm312_vm0, %v580_v2 }
 0x3a3   : > { %999 = shalt.err (!%p996_p12)
}
 0x3a4   : > { %s1000_s28 = scalar_lea.hbm %s1362_s30, 256  ;;  %s1004_s10 = scalar_lea.hbm %s1414_s3, 2048 }
 0x3a5   : > { %p1001_p11 = scmp.ne.s32.totalorder %s1362_s30, %s1000_s28  ;;  %p1005_p6 = scmp.lt.u32.totalorder %s1362_s30, %s1414_s3 }
 0x3a6   : > { %p1006_p3 = scmp.lt.u32.totalorder %s1004_s10, %s1000_s28  ;;  %p1008_p13 = scmp.lt.u32.totalorder %s1000_s28, %s1362_s30 }
 0x3a7   : > { %p1002_p5 = pnand %p1001_p11, %p1443_p7 }
 0x3a8   : > { %p1007_p2 = por %p1006_p3, %p1005_p6 }
 0x3a9   : > { %p1003_p4 = pneg %p1002_p5 }
 0x3aa   : > { %p1009_p8 = por %p1008_p13, %p1007_p2 }
 0x3ac   : > { %p1010_p9 = pnand %p1009_p8, %p1003_p4 }
 0x3ae   : > { %1013 = shalt.err (!%p1010_p9)
}
 0x3af   : > { %s1083_s11 = smov 128   ;;  %s1084_s19 = smov 8  }
 0x3b0   : > { %809 = dma.vmem_to_hbm [thread:$0]  (%p1443_p7), %s1356_s16, 256, %s1362_s30, %s584_s6, %s1083_s11, %s1083_s11, %s1084_s19  }
 0x3b1 PF: > { %p826_p0 = scmp.ge.s32.totalorder %s1072_s17, 2  ;;  %s614_s9 = sand.u32 1, %s1052_s12  }
 0x3b2   : > { %p1444_p1 = scmp.ne.s32.totalorder %s1431_s27, 0  ;;  %s615_s18 = scalar_lea.sflag [#allocation7], %s614_s9 }
 0x3b4   : > { %p822_p10 = pnand %p826_p0, %p1444_p1 }
 0x3b6   : > { %1047 = dma.done.wait (!%p822_p10), %s615_s18, 256  }
 0x3b7   : > { %1049 = vsyncadd (!%p822_p10), %s615_s18, 4294967040  ;;  %s22_s17 = sadd.s32 1, %s1072_s17   ;;  %s1445_s24 = sld [smem:[#allocation17_spill]] }
 0x3b8   : > { %p19_p12 = scmp.ge.s32.totalorder %s22_s17, 10   ;;  %s1446_s15 = sld [smem:[#allocation15_spill]] }
 0x3b9   : > { %s1447_s16 = sld [smem:[#allocation16_spill]]  ;;  %s1448_s12 = smov %s1056_s13 }
 0x3ba   : > { %s1449_s13 = smov %s1060_s14  ;;  %21 = sbr.rel (!%p19_p12) target bundleno = 10 (0xa), region = 109 }
 0x3bd   : > { %s1450_s14 = smov %s1445_s24 }
 0x3c1   :  { %620 = vsyncpa [#allocation6], 1 }
 0x3c2   :  { %622 = vsyncpa [#allocation6 + $0x1], 1 }
 0x3c3   :  { %623 = vsyncpa [#allocation9], 1 }
 0x3c4   :  { %625 = vsyncpa [#allocation9 + $0x1], 1 }
 0x3c5   :  { %626 = vsyncpa [#allocation7], 1 }
 0x3c6   :  { %628 = vsyncpa [#allocation7 + $0x1], 1 }

</bundles_post_ra>
